<compile_context>
chip_gen: v7x
topology: tpu7x:2x2x1
jax: 0.10.0
libtpu: 0.0.40
codegen_flags: <defaults>
</compile_context>

<pallas_src>
import jax
import jax.numpy as jnp
from jax.experimental import pallas as pl
from jax.experimental.pallas import tpu as pltpu


def linear_kernel(w_ref, b_ref, xT_ref, o_ref):
    """y[0, b] = sum_i w[i] * x[i, b] + bias   (pure VPU, lane-dense output).

    w_ref:  (IN,)  f32 in SMEM (scalar-prefetched)
    b_ref:  (1,)   f32 in SMEM (scalar-prefetched)
    xT_ref: (IN, TB) f32 in VMEM, batch on lanes
    o_ref:  (1,  TB) f32 in VMEM, batch on lanes
    """
    in_features = xT_ref.shape[0]
    acc = xT_ref[0:1, :] * w_ref[0]
    for i in range(1, in_features):              # IN == 3: fully unrolled
        acc = acc + xT_ref[i:i + 1, :] * w_ref[i]
    o_ref[...] = (acc + b_ref[0]).astype(o_ref.dtype)


def mynet_forward(x, weight, bias):
    """Pallas equivalent of MyNet.forward: Linear(3, 1).

    Accepts x of shape (3,) (like the PyTorch example tensor) or (B, 3).
    """
    squeeze = x.ndim == 1
    if squeeze:
        x = x[None, :]
    B, IN = x.shape
    OUT = weight.shape[0]
    assert OUT == 1, "MyNet has a single output feature"

    # Lane-dense batch tiling: one tile for small B, 512-row tiles for big B.
    LANE = 128
    TB = 512
    if B <= TB:
        TB = max(LANE, -(-B // LANE) * LANE)
    num_tiles = -(-B // TB)
    Bp = num_tiles * TB

    # Batch on the lane axis; pad batch up to the tile size.
    xT = jnp.pad(x.T, ((0, 0), (0, Bp - B)))     # (IN, Bp)
    w_flat = weight.reshape(-1)                  # (IN,)  -> SMEM scalars
    b_flat = bias.reshape(-1)                    # (1,)   -> SMEM scalar

    out = pl.pallas_call(
        linear_kernel,
        out_shape=jax.ShapeDtypeStruct((OUT, Bp), jnp.float32),
        grid_spec=pltpu.PrefetchScalarGridSpec(
            num_scalar_prefetch=2,               # weight + bias land in SMEM
            grid=(num_tiles,),
            in_specs=[pl.BlockSpec((IN, TB), lambda i, w, b: (0, i))],
            out_specs=pl.BlockSpec((OUT, TB), lambda i, w, b: (0, i)),
        ),
        compiler_params=pltpu.CompilerParams(
            dimension_semantics=("parallel",),   # shard batch tiles across TCs (v7x)
        ),
    )(w_flat, b_flat, xT)

    out = out[:, :B].T                           # (B, OUT)
    if squeeze:
        out = out[0]                             # (OUT,) like PyTorch on a 1-D input
    return out


if __name__ == "__main__":
    key = jax.random.PRNGKey(0)
    k_w, k_b, k_x = jax.random.split(key, 3)

    in_features, out_features = 3, 1
    # Deterministic init mimicking nn.Linear's default U(-1/sqrt(fan_in), 1/sqrt(fan_in)).
    bound = 1.0 / jnp.sqrt(jnp.float32(in_features))
    weight = jax.random.uniform(k_w, (out_features, in_features),
                                minval=-bound, maxval=bound, dtype=jnp.float32)
    bias = jax.random.uniform(k_b, (out_features,),
                              minval=-bound, maxval=bound, dtype=jnp.float32)

    # Small batch of inputs, plus the literal example vector [1, 2, 3].
    x_batch = jax.random.normal(k_x, (2, in_features), dtype=jnp.float32)
    x_vec = jnp.array([1.0, 2.0, 3.0], dtype=jnp.float32)

    out_batch = jax.block_until_ready(mynet_forward(x_batch, weight, bias))
    out_vec = jax.block_until_ready(mynet_forward(x_vec, weight, bias))

    # Cross-check against plain JAX reference.
    ref_batch = x_batch @ weight.T + bias
    ref_vec = x_vec @ weight.T + bias
    assert out_batch.shape == (2, 1)
    assert out_vec.shape == (1,)
    assert jnp.allclose(out_batch, ref_batch, atol=1e-5)
    assert jnp.allclose(out_vec, ref_vec, atol=1e-5)

    print("KERNEL_OK")
</pallas_src>

<mosaic_0001>
module attributes {stable_mosaic.version = 11 : i64} {
  func.func @linear_kernel(%arg0: i32, %arg1: memref<3xf32, #tpu.memory_space<smem>>, %arg2: memref<1xf32, #tpu.memory_space<smem>>, %arg3: memref<3x128xf32, #tpu.memory_space<vmem>>, %arg4: memref<1x128xf32, #tpu.memory_space<vmem>>) attributes {dimension_semantics = [#tpu.dimension_semantics<parallel>], iteration_bounds = array<i64: 1>, scalar_prefetch = 2 : i64, scratch_operands = 0 : i64, tpu.core_type = #tpu.core_type<tc>, window_params = [{transform_indices = @transform_0, window_bounds = array<i64: 3, 128>}, {transform_indices = @transform_1, window_bounds = array<i64: 1, 128>}]} {
    %c0 = arith.constant 0 : index
    %c0_0 = arith.constant 0 : index
    %0 = vector.load %arg3[%c0, %c0_0] : memref<3x128xf32, #tpu.memory_space<vmem>>, vector<1x128xf32>
    %c0_1 = arith.constant 0 : index
    %1 = memref.load %arg1[%c0_1] : memref<3xf32, #tpu.memory_space<smem>>
    %2 = vector.broadcast %1 : f32 to vector<1x128xf32>
    %3 = arith.mulf %0, %2 : vector<1x128xf32>
    %c1 = arith.constant 1 : index
    %c0_2 = arith.constant 0 : index
    %4 = vector.load %arg3[%c1, %c0_2] : memref<3x128xf32, #tpu.memory_space<vmem>>, vector<1x128xf32>
    %c1_3 = arith.constant 1 : index
    %5 = memref.load %arg1[%c1_3] : memref<3xf32, #tpu.memory_space<smem>>
    %6 = vector.broadcast %5 : f32 to vector<1x128xf32>
    %7 = arith.mulf %4, %6 : vector<1x128xf32>
    %8 = arith.addf %3, %7 : vector<1x128xf32>
    %c2 = arith.constant 2 : index
    %c0_4 = arith.constant 0 : index
    %9 = vector.load %arg3[%c2, %c0_4] : memref<3x128xf32, #tpu.memory_space<vmem>>, vector<1x128xf32>
    %c2_5 = arith.constant 2 : index
    %10 = memref.load %arg1[%c2_5] : memref<3xf32, #tpu.memory_space<smem>>
    %11 = vector.broadcast %10 : f32 to vector<1x128xf32>
    %12 = arith.mulf %9, %11 : vector<1x128xf32>
    %13 = arith.addf %8, %12 : vector<1x128xf32>
    %c0_6 = arith.constant 0 : index
    %14 = memref.load %arg2[%c0_6] : memref<1xf32, #tpu.memory_space<smem>>
    %15 = vector.broadcast %14 : f32 to vector<1x128xf32>
    %16 = arith.addf %13, %15 : vector<1x128xf32>
    %c0_7 = arith.constant 0 : index
    %c0_8 = arith.constant 0 : index
    %17 = vector.load %arg4[%c0_7, %c0_8] : memref<1x128xf32, #tpu.memory_space<vmem>>, vector<1x128xf32>
    tpu.vector_store %arg4[%c0_7, %c0_8], %16 {strides = array<i32>} : memref<1x128xf32, #tpu.memory_space<vmem>>, vector<1x128xf32>,
    return
  }
  func.func @transform_0(%arg0: i32, %arg1: memref<3xf32, #tpu.memory_space<smem>>, %arg2: memref<1xf32, #tpu.memory_space<smem>>) -> (i32, i32) {
    %c0_i32 = arith.constant 0 : i32
    %c0_i32_0 = arith.constant 0 : i32
    return %c0_i32, %arg0 : i32, i32
  }
  func.func @transform_1(%arg0: i32, %arg1: memref<3xf32, #tpu.memory_space<smem>>, %arg2: memref<1xf32, #tpu.memory_space<smem>>) -> (i32, i32) {
    %c0_i32 = arith.constant 0 : i32
    %c0_i32_0 = arith.constant 0 : i32
    return %c0_i32, %arg0 : i32, i32
  }
}

</mosaic_0001>

<bundles_post_ra>
// kernel: tpu_custom_call.1
= control target key start
LH: loop header
LB: loop body
LE: loop exit
PB: predicated region body
PF: predicated region fallthrough
CT: control target
= control target key end

     0   :  { %s141_s0 = inlined_call_operand.vmem [shape: f32[3], index: 0, kind: input, shape index: {}]   ;;  %s142_s1 = inlined_call_operand.<no memory space> [shape: f32[1], index: 1, kind: input, shape index: {}]   ;;  %s143_s2 = inlined_call_operand.vmem [shape: f32[3,128], index: 2, kind: input, shape index: {}]   ;;  %s144_s3 = inlined_call_operand.hbm [shape: f32[1,128], index: 3, kind: output, shape index: {}]  }
   0x1   :  { %s8_s14 = sshll.u32 %s141_s0, 4  ;;  %s9_s14 = int_to_ptr.vmem [resolvable:$true] %s8_s14 }
   0x2   :  { %s54_s15 = scalar_lea.vmem %s9_s14, 16  ;;  %p59_p1 = scmp.lt.s32.totalorder %s9_s14, %s9_s14 }
   0x3   :  { %p55_p0 = scmp.ne.s32.totalorder %s9_s14, %s54_s15  ;;  %p60_p2 = scmp.lt.s32.totalorder %s54_s15, %s54_s15 }
   0x5   :  { %p61_p3 = por %p60_p2, %p59_p1 }
   0x7   :  { %p62_p4 = pnand %p61_p3, %p55_p0 }
   0x9   :  { %65 = shalt.err (!%p62_p4)  }
   0xa   :  { %s92_s16 = smov [#allocation3]  }
   0xb   :  { %11 = dma.vmem_to_smem %s9_s14, 16, %s92_s16, [#allocation2] }
   0xc   :  { %88 = dma.done.wait [#allocation2], 16 }
   0xd   :  { %89 = vsyncadd [#allocation2], 4294967280 }
   0xe   :  { %14 = sfence }
   0xf   :  { %s19_s17 = sld [smem:[#allocation3]]  ;;  %s50_s18 = sld [smem:[#allocation3 + $0x1]] }
  0x10   :  { %s51_s19 = sld [smem:[#allocation3 + $0x2]] }
  0x11   :  { %15 = vsyncpa [#allocation6], 0  ;;  %v18_v0 = vld [vmem:[%s143_s2] sm:$0x1]  ;;  %v22_v1 = vld [vmem:[%s143_s2 + $0x1] sm:$0x1]  ;;  %v33_v10 = vstv %s142_s1 }
  0x12   :  { %v27_v2 = vld [vmem:[%s143_s2 + $0x2] sm:$0x1]  ;;  %s93_s27 = smov [#allocation5]  }
  0x13   :  { %s42_s28 = sshll.u32 %s93_s27, 4  ;;  %s43_s28 = int_to_ptr.vmem [resolvable:$true] %s42_s28 }
  0x14   :  { %s66_s29 = scalar_lea.vmem %s43_s28, 16  ;;  %s70_s2 = scalar_lea.vmem %s43_s28, 32 }
  0x15   :  { %v20_v3 = vstv %s19_s17  ;;  %v24_v5 = vstv %s50_s18  ;;  %p67_p5 = scmp.ne.s32.totalorder %s43_s28, %s66_s29  ;;  %p71_p6 = scmp.lt.s32.totalorder %s43_s28, %s43_s28 }
  0x16   :  { %v21_v4 = vmul.f32 %v20_v3, %v18_v0  ;;  %v29_v6 = vstv %s51_s19  ;;  %v25_v7 = vmul.f32 %v24_v5, %v22_v1  ;;  %p72_p7 = scmp.lt.s32.totalorder %s70_s2, %s66_s29 }
  0x17   :  { %v30_v8 = vmul.f32 %v29_v6, %v27_v2 }
  0x18   :  { %v26_v9 = vadd.f32 %v25_v7, %v21_v4  ;;  %p73_p8 = por %p72_p7, %p71_p6 }
  0x1a   :  { %v31_v11 = vadd.f32 %v30_v8, %v26_v9  ;;  %p74_p9 = pnand %p73_p8, %p67_p5 }
  0x1c   :  { %v34_v12 = vadd.f32 %v33_v10, %v31_v11 }
  0x1e   :  { %35 = vst [vmem:[#allocation5] sm:$0x1] %v34_v12 }
  0x1f   :  { %77 = shalt.err (!%p74_p9)
}
  0x20   :  { %s78_s5 = scalar_lea.hbm %s144_s3, 16 }
  0x21   :  { %p79_p10 = scmp.ne.s32.totalorder %s144_s3, %s78_s5  ;;  %p82_p11 = scmp.lt.u32.totalorder %s78_s5, %s144_s3 }
  0x23   :  { %p84_p12 = pnand %p82_p11, %p79_p10 }
  0x25   :  { %87 = shalt.err (!%p84_p12)
}
  0x26   :  { %45 = dma.vmem_to_hbm [thread:$0]  %s43_s28, 16, %s144_s3, [#allocation6]  }
  0x27   :  { %90 = dma.done.wait [#allocation6], 16  }
  0x28   :  { %91 = vsyncadd [#allocation6], 4294967280 }
  0x29   :  { %49 = vsyncpa [#allocation6], 1 }

</bundles_post_ra>
